<compile_context>
chip_gen: v7x
topology: tpu7x:2x2x1
jax: 0.10.0
libtpu: 0.0.40
codegen_flags: <defaults>
</compile_context>

<pallas_src>
import functools

import jax
import jax.numpy as jnp
from jax import lax
from jax.experimental import pallas as pl
from jax.experimental.pallas import tpu as pltpu


def _ffn_softmax_kernel(*refs, sub_rows, approx_recip, has_evb):
    # refs (has_evb=True):  x, W1^T, bias1, W2^T, b2, evb, out
    # refs (has_evb=False): x, W1^T, bias1, W2^T, b2, out
    if has_evb:
        x_ref, w1_ref, bias1_ref, w2_ref, b2_ref, evb_ref, o_ref = refs
    else:
        x_ref, w1_ref, bias1_ref, w2_ref, b2_ref, o_ref = refs
        evb_ref = None

    n_sub = x_ref.shape[0] // sub_rows

    def body(j, carry):
        r0 = pl.multiple_of(j * sub_rows, sub_rows)
        xs = x_ref[pl.ds(r0, sub_rows), :]                       # [sub, Hp]

        s1 = jnp.dot(xs, w1_ref[...], preferred_element_type=jnp.float32)
        s1 = s1 + bias1_ref[...]                                 # fused b1 + ext bias

        # Softmax over the ffn dim (lanes). Keep ALL softmax math in f32
        # (v5e has no bf16 VPU/EUP; f32 is also what we want numerically).
        m = jnp.max(s1, axis=-1, keepdims=True)
        p = jnp.exp(s1 - m)
        denom = jnp.sum(p, axis=-1, keepdims=True)
        p = p * pl.reciprocal(denom, approx=approx_recip)        # EUP, not a VALU divide

        s2 = jnp.dot(p.astype(w2_ref.dtype), w2_ref[...],
                     preferred_element_type=jnp.float32)
        s2 = s2 + b2_ref[...]
        if has_evb:
            s2 = s2 + evb_ref[pl.ds(r0, sub_rows), :].astype(jnp.float32)

        o_ref[pl.ds(r0, sub_rows), :] = s2.astype(o_ref.dtype)
        return carry

    lax.fori_loop(0, n_sub, body, 0, unroll=True)


def _round_up(n, m):
    return (n + m - 1) // m * m


def _vmem_budget():
    """Generation-aware (vmem_limit_bytes, default row tile)."""
    try:
        cap = pltpu.get_tpu_info().vmem_capacity_bytes
    except Exception:
        cap = None
    if cap is None:
        # Conservative fallback: safe on every generation (incl. 64 MiB v7x).
        return 48 * 1024 * 1024, 256
    if cap >= 96 * 1024 * 1024:
        # v5e / v6e: 128 MiB physical VMEM -> generous scoped limit, big tiles.
        return 100 * 1024 * 1024, 512
    # v7x: 64 MiB physical per TC -> leave headroom for Mosaic internal scratch.
    return min(cap - 16 * 1024 * 1024, 48 * 1024 * 1024), 256


def _resident_spec(shape):
    """BlockSpec for a grid-invariant operand: fetched once, single-buffered."""
    if hasattr(pl, "Buffered"):
        try:
            return pl.BlockSpec(shape, lambda i: (0, 0),
                                pipeline_mode=pl.Buffered(1))
        except TypeError:
            pass
    return pl.BlockSpec(shape, lambda i: (0, 0))


@functools.partial(jax.jit, static_argnames=("tm", "compute_dtype"))
def memory_adapter_layer(x, w1, b1, w2, b2, external_bias=None,
                         external_value_bias=None, *, tm=None,
                         compute_dtype=jnp.bfloat16):
    """x: [B, S, H]; w1: [F, H]; b1: [F]; w2: [H, F]; b2: [H];
    external_bias: [1, F] or None; external_value_bias: [B, S, H] or None."""
    B, S, H = x.shape
    F = w1.shape[0]
    M = B * S
    out_dtype = x.dtype

    # Lane-dense padding of hidden / ffn dims (multiples of 128 lanes).
    Hp = _round_up(H, 128)
    Fp = _round_up(F, 128)

    # Generation-aware VMEM limit and row tile; clamp for small M, pad M up.
    vmem_limit, tm_default = _vmem_budget()
    tm_req = tm if tm is not None else tm_default
    tm_eff = min(tm_req, _round_up(M, 8))
    Mp = _round_up(M, tm_eff)
    # (Rows padded M..Mp run a wasted softmax over a pure-bias row; harmless,
    #  sliced off below.)

    # In-kernel row sub-tile: keeps the [sub, Fp] f32 intermediate small.
    if tm_eff % 256 == 0:
        sub_rows = 256
    elif tm_eff % 128 == 0:
        sub_rows = 128
    else:
        sub_rows = tm_eff

    x_flat = jnp.pad(x.reshape(M, H), ((0, Mp - M), (0, Hp - H)))
    x_flat = x_flat.astype(compute_dtype)

    has_evb = external_value_bias is not None
    if has_evb:
        evb_flat = external_value_bias.reshape(M, H).astype(compute_dtype)
        evb_flat = jnp.pad(evb_flat, ((0, Mp - M), (0, Hp - H)))

    # Fuse b1 with the [1, F] broadcast external_bias; pad softmax columns
    # with a large negative so they get ~0 probability.
    bias1 = b1.reshape(1, F).astype(jnp.float32)
    if external_bias is not None:
        # TODO(synk): a per-token [B, S, F] external_bias would need its own
        # per-row-tile input stream; only the [1, F] broadcast form is fused.
        if external_bias.size != F:
            raise ValueError(
                f"Only a [1, {F}] broadcast external_bias is supported; "
                f"got shape {external_bias.shape}.")
        bias1 = bias1 + external_bias.reshape(1, F).astype(jnp.float32)
    bias1 = jnp.pad(bias1, ((0, 0), (0, Fp - F)), constant_values=-1e30)

    w1t = jnp.pad(w1.T, ((0, Hp - H), (0, Fp - F))).astype(compute_dtype)  # [Hp,Fp]
    w2t = jnp.pad(w2.T, ((0, Fp - F), (0, Hp - H))).astype(compute_dtype)  # [Fp,Hp]
    b2_2d = jnp.pad(b2.reshape(1, H).astype(jnp.float32),
                    ((0, 0), (0, Hp - H)))

    kernel = functools.partial(
        _ffn_softmax_kernel,
        sub_rows=sub_rows,
        approx_recip=(jnp.dtype(compute_dtype) != jnp.dtype(jnp.float32)),
        has_evb=has_evb)

    in_specs = [
        pl.BlockSpec((tm_eff, Hp), lambda i: (i, 0)),   # x rows (double-buffered)
        _resident_spec((Hp, Fp)),                       # W1^T   (single-buffered)
        _resident_spec((1, Fp)),                        # fused b1 + ext bias
        _resident_spec((Fp, Hp)),                       # W2^T
        _resident_spec((1, Hp)),                        # b2
    ]
    operands = [x_flat, w1t, bias1, w2t, b2_2d]
    if has_evb:
        in_specs.append(pl.BlockSpec((tm_eff, Hp), lambda i: (i, 0)))
        operands.append(evb_flat)

    out_flat = pl.pallas_call(
        kernel,
        out_shape=jax.ShapeDtypeStruct((Mp, Hp), out_dtype),
        grid_spec=pltpu.PrefetchScalarGridSpec(
            num_scalar_prefetch=0,
            grid=(Mp // tm_eff,),
            in_specs=in_specs,
            out_specs=pl.BlockSpec((tm_eff, Hp), lambda i: (i, 0)),
        ),
        compiler_params=pltpu.CompilerParams(
            dimension_semantics=("parallel",),
            vmem_limit_bytes=vmem_limit,
        ),
    )(*operands)

    return out_flat[:M, :H].reshape(B, S, H)


def _reference(x, w1, b1, w2, b2, eb, evb):
    s1 = jnp.einsum("bsh,fh->bsf", x, w1) + b1
    if eb is not None:
        s1 = s1 + eb[None]                    # [1,F] broadcasts over B,S
    s1 = jax.nn.softmax(s1, axis=-1)
    s2 = jnp.einsum("bsf,hf->bsh", s1, w2) + b2
    if evb is not None:
        s2 = s2 + evb
    return s2


if __name__ == "__main__":
    B, S, H, F = 2, 8, 32, 128     # batch, seq, input_dim, ff_dim
    key = jax.random.PRNGKey(0)
    kx, k1, kb1, k2, kb2, keb, kevb = jax.random.split(key, 7)

    x = jax.random.normal(kx, (B, S, H), dtype=jnp.float32)
    # Deterministic "Linear" parameter init (shapes follow nn.Linear).
    w1 = jax.random.normal(k1, (F, H), dtype=jnp.float32) * 0.05    # w_1.weight
    b1 = jax.random.normal(kb1, (F,), dtype=jnp.float32) * 0.05     # w_1.bias
    w2 = jax.random.normal(k2, (H, F), dtype=jnp.float32) * 0.05    # w_2.weight
    b2 = jax.random.normal(kb2, (H,), dtype=jnp.float32) * 0.05     # w_2.bias
    external_bias = jax.random.normal(keb, (1, F), dtype=jnp.float32)
    external_value_bias = jax.random.normal(kevb, (B, S, H), dtype=jnp.float32)

    ref_full = _reference(x, w1, b1, w2, b2, external_bias, external_value_bias)
    ref_plain = _reference(x, w1, b1, w2, b2, None, None)

    # f32 compute path with both optional biases (exact reciprocal -> tight check).
    out_f32 = jax.block_until_ready(
        memory_adapter_layer(x, w1, b1, w2, b2, external_bias,
                             external_value_bias, compute_dtype=jnp.float32))
    assert out_f32.shape == (B, S, H)
    assert jnp.allclose(out_f32, ref_full, atol=1e-3, rtol=1e-3), \
        f"f32 max err {jnp.max(jnp.abs(out_f32 - ref_full))}"

    # bf16 MXU path (default, looser tolerance for bf16 matmul inputs).
    out_bf16 = jax.block_until_ready(
        memory_adapter_layer(x, w1, b1, w2, b2, external_bias,
                             external_value_bias))
    assert out_bf16.shape == (B, S, H)
    assert jnp.allclose(out_bf16, ref_full, atol=2.5e-2, rtol=2.5e-2), \
        f"bf16 max err {jnp.max(jnp.abs(out_bf16 - ref_full))}"

    # No external biases: exercises the kernel variant without the evb stream.
    out_plain = jax.block_until_ready(memory_adapter_layer(x, w1, b1, w2, b2))
    assert out_plain.shape == (B, S, H)
    assert jnp.allclose(out_plain, ref_plain, atol=2.5e-2, rtol=2.5e-2), \
        f"plain max err {jnp.max(jnp.abs(out_plain - ref_plain))}"

    print("KERNEL_OK")
</pallas_src>

<mosaic_0001>
module attributes {stable_mosaic.version = 11 : i64} {
  func.func @_ffn_softmax_kernel(%arg0: i32, %arg1: memref<16x128xf32, #tpu.memory_space<vmem>>, %arg2: memref<128x128xf32, #tpu.memory_space<vmem>>, %arg3: memref<1x128xf32, #tpu.memory_space<vmem>>, %arg4: memref<128x128xf32, #tpu.memory_space<vmem>>, %arg5: memref<1x128xf32, #tpu.memory_space<vmem>>, %arg6: memref<16x128xf32, #tpu.memory_space<vmem>>, %arg7: memref<16x128xf32, #tpu.memory_space<vmem>>) attributes {dimension_semantics = [#tpu.dimension_semantics<parallel>], iteration_bounds = array<i64: 1>, scalar_prefetch = 0 : i64, scratch_operands = 0 : i64, tpu.core_type = #tpu.core_type<tc>, window_params = [{transform_indices = @transform_0, window_bounds = array<i64: 16, 128>}, {pipeline_mode = #tpu.pipeline_mode<synchronous>, transform_indices = @transform_1, window_bounds = array<i64: 128, 128>}, {pipeline_mode = #tpu.pipeline_mode<synchronous>, transform_indices = @transform_2, window_bounds = array<i64: 1, 128>}, {pipeline_mode = #tpu.pipeline_mode<synchronous>, transform_indices = @transform_3, window_bounds = array<i64: 128, 128>}, {pipeline_mode = #tpu.pipeline_mode<synchronous>, transform_indices = @transform_4, window_bounds = array<i64: 1, 128>}, {transform_indices = @transform_5, window_bounds = array<i64: 16, 128>}, {transform_indices = @transform_6, window_bounds = array<i64: 16, 128>}]} {
    %c0_i32 = arith.constant 0 : i32
    %c16_i32 = arith.constant 16 : i32
    %0 = arith.muli %c0_i32, %c16_i32 : i32
    %1 = tpu.assume_multiple %0, 16 : i32
    %2 = arith.index_cast %1 : i32 to index
    %c0 = arith.constant 0 : index
    %3 = vector.load %arg1[%2, %c0] : memref<16x128xf32, #tpu.memory_space<vmem>>, vector<16x128xf32>
    %c0_0 = arith.constant 0 : index
    %c0_1 = arith.constant 0 : index
    %4 = vector.load %arg2[%c0_0, %c0_1] : memref<128x128xf32, #tpu.memory_space<vmem>>, vector<128x128xf32>
    %cst = arith.constant dense<0.000000e+00> : vector<16x128xf32>
    %5 = tpu.matmul %3, %4, %cst {dimension_numbers = #tpu.dot_dimension_numbers<[1], [0], [0], [1], [0, 0, 1, 1], [], []>} : vector<16x128xf32>, vector<128x128xf32>, vector<16x128xf32> -> vector<16x128xf32>
    %c0_2 = arith.constant 0 : index
    %c0_3 = arith.constant 0 : index
    %6 = vector.load %arg3[%c0_2, %c0_3] : memref<1x128xf32, #tpu.memory_space<vmem>>, vector<1x128xf32>
    %7 = vector.broadcast %6 : vector<1x128xf32> to vector<16x128xf32>
    %8 = arith.addf %5, %7 : vector<16x128xf32>
    %cst_4 = arith.constant dense<0xFF800000> : vector<16xf32>
    %9 = vector.multi_reduction <maximumf>, %8, %cst_4 [1] : vector<16x128xf32> to vector<16xf32>
    %10 = vector.shape_cast %9 : vector<16xf32> to vector<16x1xf32>
    %11 = vector.broadcast %10 : vector<16x1xf32> to vector<16x128xf32>
    %12 = arith.subf %8, %11 : vector<16x128xf32>
    %13 = math.exp %12 : vector<16x128xf32>
    %cst_5 = arith.constant dense<0.000000e+00> : vector<16xf32>
    %14 = vector.multi_reduction <add>, %13, %cst_5 [1] : vector<16x128xf32> to vector<16xf32>
    %15 = vector.shape_cast %14 : vector<16xf32> to vector<16x1xf32>
    %16 = tpu.reciprocal %15 : vector<16x1xf32> -> vector<16x1xf32>
    %17 = vector.broadcast %16 : vector<16x1xf32> to vector<16x128xf32>
    %18 = arith.mulf %13, %17 : vector<16x128xf32>
    %c0_6 = arith.constant 0 : index
    %c0_7 = arith.constant 0 : index
    %19 = vector.load %arg4[%c0_6, %c0_7] : memref<128x128xf32, #tpu.memory_space<vmem>>, vector<128x128xf32>
    %cst_8 = arith.constant dense<0.000000e+00> : vector<16x128xf32>
    %20 = tpu.matmul %18, %19, %cst_8 {dimension_numbers = #tpu.dot_dimension_numbers<[1], [0], [0], [1], [0, 0, 1, 1], [], []>} : vector<16x128xf32>, vector<128x128xf32>, vector<16x128xf32> -> vector<16x128xf32>
    %c0_9 = arith.constant 0 : index
    %c0_10 = arith.constant 0 : index
    %21 = vector.load %arg5[%c0_9, %c0_10] : memref<1x128xf32, #tpu.memory_space<vmem>>, vector<1x128xf32>
    %22 = vector.broadcast %21 : vector<1x128xf32> to vector<16x128xf32>
    %23 = arith.addf %20, %22 : vector<16x128xf32>
    %24 = arith.index_cast %1 : i32 to index
    %c0_11 = arith.constant 0 : index
    %25 = vector.load %arg6[%24, %c0_11] : memref<16x128xf32, #tpu.memory_space<vmem>>, vector<16x128xf32>
    %26 = arith.addf %23, %25 : vector<16x128xf32>
    %27 = arith.index_cast %1 : i32 to index
    %c0_12 = arith.constant 0 : index
    %28 = vector.load %arg7[%27, %c0_12] : memref<16x128xf32, #tpu.memory_space<vmem>>, vector<16x128xf32>
    tpu.vector_store %arg7[%27, %c0_12], %26 {strides = array<i32>} : memref<16x128xf32, #tpu.memory_space<vmem>>, vector<16x128xf32>,
    %c1_i32 = arith.constant 1 : i32
    return
  }
  func.func @transform_0(%arg0: i32) -> (i32, i32) {
    %c0_i32 = arith.constant 0 : i32
    %c0_i32_0 = arith.constant 0 : i32
    return %arg0, %c0_i32 : i32, i32
  }
  func.func @transform_1(%arg0: i32) -> (i32, i32) {
    %c0_i32 = arith.constant 0 : i32
    %c0_i32_0 = arith.constant 0 : i32
    %c0_i32_1 = arith.constant 0 : i32
    return %c0_i32, %c0_i32_0 : i32, i32
  }
  func.func @transform_2(%arg0: i32) -> (i32, i32) {
    %c0_i32 = arith.constant 0 : i32
    %c0_i32_0 = arith.constant 0 : i32
    %c0_i32_1 = arith.constant 0 : i32
    return %c0_i32, %c0_i32_0 : i32, i32
  }
  func.func @transform_3(%arg0: i32) -> (i32, i32) {
    %c0_i32 = arith.constant 0 : i32
    %c0_i32_0 = arith.constant 0 : i32
    %c0_i32_1 = arith.constant 0 : i32
    return %c0_i32, %c0_i32_0 : i32, i32
  }
  func.func @transform_4(%arg0: i32) -> (i32, i32) {
    %c0_i32 = arith.constant 0 : i32
    %c0_i32_0 = arith.constant 0 : i32
    %c0_i32_1 = arith.constant 0 : i32
    return %c0_i32, %c0_i32_0 : i32, i32
  }
  func.func @transform_5(%arg0: i32) -> (i32, i32) {
    %c0_i32 = arith.constant 0 : i32
    %c0_i32_0 = arith.constant 0 : i32
    return %arg0, %c0_i32 : i32, i32
  }
  func.func @transform_6(%arg0: i32) -> (i32, i32) {
    %c0_i32 = arith.constant 0 : i32
    %c0_i32_0 = arith.constant 0 : i32
    return %arg0, %c0_i32 : i32, i32
  }
}

</mosaic_0001>

<bundles_post_ra>
// kernel: memory_adapter_layer.1
= control target key start
LH: loop header
LB: loop body
LE: loop exit
PB: predicated region body
PF: predicated region fallthrough
CT: control target
= control target key end

     0   :  { %s584_s1 = inlined_call_operand.vmem [shape: f32[128,128], index: 1, kind: input, shape index: {}]   ;;  %s585_s0 = inlined_call_operand.vmem [shape: f32[16,128], index: 0, kind: input, shape index: {}]   ;;  %s586_s2 = inlined_call_operand.vmem [shape: f32[1,128], index: 2, kind: input, shape index: {}]   ;;  %s587_s3 = inlined_call_operand.vmem [shape: f32[128,128], index: 3, kind: input, shape index: {}]   ;;  %s588_s4 = inlined_call_operand.vmem [shape: f32[1,128], index: 4, kind: input, shape index: {}]   ;;  %s589_s5 = inlined_call_operand.vmem [shape: f32[16,128], index: 5, kind: input, shape index: {}]   ;;  %s590_s6 = inlined_call_operand.vmem [shape: f32[16,128], index: 6, kind: output, shape index: {}]  }
   0x1   :  { %v25_v0 = vld [vmem:[%s584_s1] sm:$0xff]  ;;  %v26_v1 = vld [vmem:[%s584_s1 + $0x8] sm:$0xff]  ;;  %v27_v2 = vld [vmem:[%s584_s1 + $0x10] sm:$0xff] }
   0x2   :  { %v357_v3 = vpack.c.bf16 %v26_v1, %v25_v0  ;;  %v28_v4 = vld [vmem:[%s584_s1 + $0x18] sm:$0xff]  ;;  %v29_v6 = vld [vmem:[%s584_s1 + $0x20] sm:$0xff]  ;;  %v30_v7 = vld [vmem:[%s584_s1 + $0x28] sm:$0xff] }
   0x3   :  { %v361_v5 = vpack.c.bf16 %v28_v4, %v27_v2  ;;  %v365_v8 = vpack.c.bf16 %v30_v7, %v29_v6  ;;  %v23_v9 = vld [vmem:[%s585_s0] sm:$0xff]  ;;  %v31_v10 = vld [vmem:[%s584_s1 + $0x30] sm:$0xff]  ;;  %v32_v11 = vld [vmem:[%s584_s1 + $0x38] sm:$0xff] }
   0x4   :  { %358 = vmatprep.subr.bf16.mxu0 %v357_v3  ;;  %319 = vmatprep.mubr.f32.mxu0 %v23_v9  ;;  %v369_v12 = vpack.c.bf16 %v32_v11, %v31_v10  ;;  %v33_v13 = vld [vmem:[%s584_s1 + $0x40] sm:$0xff]  ;;  %v34_v14 = vld [vmem:[%s584_s1 + $0x48] sm:$0xff]  ;;  %v35_v16 = vld [vmem:[%s584_s1 + $0x50] sm:$0xff] }
   0x5   :  { %360 = vmatpush3.bf16.msra.mxu0 %v357_v3  ;;  %v373_v15 = vpack.c.bf16 %v34_v14, %v33_v13  ;;  %v36_v17 = vld [vmem:[%s584_s1 + $0x58] sm:$0xff]  ;;  %v37_v19 = vld [vmem:[%s584_s1 + $0x60] sm:$0xff]  ;;  %v38_v20 = vld [vmem:[%s584_s1 + $0x68] sm:$0xff] }
   0x6   :  { %362 = vmatprep.subr.bf16.mxu0 %v361_v5  ;;  %v377_v18 = vpack.c.bf16 %v36_v17, %v35_v16  ;;  %v381_v21 = vpack.c.bf16 %v38_v20, %v37_v19  ;;  %v39_v22 = vld [vmem:[%s584_s1 + $0x70] sm:$0xff]  ;;  %v40_v23 = vld [vmem:[%s584_s1 + $0x78] sm:$0xff]  ;;  %v24_v25 = vld [vmem:[%s585_s0 + $0x8] sm:$0xff] }
   0x7   :  { %v385_v24 = vpack.c.bf16 %v40_v23, %v39_v22  ;;  %v249_v26 = vld [vmem:[%s586_s2] ss:$0 sm:$0xff]  ;;  %v142_v32 = vld [vmem:[%s587_s3 + $0x8] sm:$0xff]  ;;  %v143_v33 = vld [vmem:[%s587_s3 + $0x10] sm:$0xff] }
   0x8   :  { %v141_v31 = vld [vmem:[%s587_s3] sm:$0xff]  ;;  %v144_v35 = vld [vmem:[%s587_s3 + $0x18] sm:$0xff]  ;;  %v146_v38 = vld [vmem:[%s587_s3 + $0x28] sm:$0xff] }
   0x9   :  { %364 = vmatpush3.bf16.msra.mxu0 %v361_v5  ;;  %v389_v34 = vpack.c.bf16 %v142_v32, %v141_v31  ;;  %v393_v36 = vpack.c.bf16 %v144_v35, %v143_v33  ;;  %v145_v37 = vld [vmem:[%s587_s3 + $0x20] sm:$0xff]  ;;  %v147_v40 = vld [vmem:[%s587_s3 + $0x30] sm:$0xff]  ;;  %v148_v41 = vld [vmem:[%s587_s3 + $0x38] sm:$0xff] }
   0xa   :  { %366 = vmatprep.subr.bf16.mxu0 %v365_v8  ;;  %v397_v39 = vpack.c.bf16 %v146_v38, %v145_v37  ;;  %v401_v42 = vpack.c.bf16 %v148_v41, %v147_v40  ;;  %v149_v51 = vld [vmem:[%s587_s3 + $0x40] sm:$0xff]  ;;  %v150_v52 = vld [vmem:[%s587_s3 + $0x48] sm:$0xff]  ;;  %v151_v54 = vld [vmem:[%s587_s3 + $0x50] sm:$0xff] }
   0xb   :  { %390 = vmatprep.subr.bf16.mxu1 %v389_v34  ;;  %v405_v53 = vpack.c.bf16 %v150_v52, %v149_v51  ;;  %v152_v55 = vld [vmem:[%s587_s3 + $0x58] sm:$0xff]  ;;  %v153_v57 = vld [vmem:[%s587_s3 + $0x60] sm:$0xff]  ;;  %v154_v58 = vld [vmem:[%s587_s3 + $0x68] sm:$0xff] }
   0xc   :  { %392 = vmatpush3.bf16.msra.mxu1 %v389_v34  ;;  %v409_v56 = vpack.c.bf16 %v152_v55, %v151_v54  ;;  %v155_v59 = vld [vmem:[%s587_s3 + $0x70] sm:$0xff]  ;;  %v413_v60 = vpack.c.bf16 %v154_v58, %v153_v57  ;;  %v156_v61 = vld [vmem:[%s587_s3 + $0x78] sm:$0xff]  ;;  %v250_v5 = vld [vmem:[%s588_s4] ss:$0 sm:$0xff] }
   0xd   :  { %368 = vmatpush3.bf16.msra.mxu0 %v365_v8  ;;  %394 = vmatprep.subr.bf16.mxu1 %v393_v36  ;;  %v417_v62 = vpack.c.bf16 %v156_v61, %v155_v59  ;;  %v240_v7 = vld [vmem:[%s589_s5 + $0x8] sm:$0xff]  ;;  %v239_v10 = vld [vmem:[%s589_s5] sm:$0xff] }
   0xe   :  { %370 = vmatprep.subr.bf16.mxu0 %v369_v12 }
  0x10   :  { %396 = vmatpush3.bf16.msra.mxu1 %v393_v36 }
  0x11   :  { %372 = vmatpush3.bf16.msra.mxu0 %v369_v12  ;;  %398 = vmatprep.subr.bf16.mxu1 %v397_v39 }
  0x12   :  { %374 = vmatprep.subr.bf16.mxu0 %v373_v15 }
  0x14   :  { %400 = vmatpush3.bf16.msra.mxu1 %v397_v39 }
  0x15   :  { %376 = vmatpush3.bf16.msra.mxu0 %v373_v15  ;;  %402 = vmatprep.subr.bf16.mxu1 %v401_v42 }
  0x16   :  { %378 = vmatprep.subr.bf16.mxu0 %v377_v18 }
  0x18   :  { %404 = vmatpush3.bf16.msra.mxu1 %v401_v42 }
  0x19   :  { %380 = vmatpush3.bf16.msra.mxu0 %v377_v18  ;;  %406 = vmatprep.subr.bf16.mxu1 %v405_v53 }
  0x1a   :  { %382 = vmatprep.subr.bf16.mxu0 %v381_v21 }
  0x1c   :  { %408 = vmatpush3.bf16.msra.mxu1 %v405_v53 }
  0x1d   :  { %384 = vmatpush3.bf16.msra.mxu0 %v381_v21  ;;  %410 = vmatprep.subr.bf16.mxu1 %v409_v56 }
  0x1e   :  { %386 = vmatprep.subr.bf16.mxu0 %v385_v24 }
  0x20   :  { %412 = vmatpush3.bf16.msra.mxu1 %v409_v56 }
  0x21   :  { %388 = vmatpush3.bf16.msra.mxu0 %v385_v24  ;;  %414 = vmatprep.subr.bf16.mxu1 %v413_v60 }
  0x24   :  { %320 = vmatmul.mubr.f32.vlgmr.msra.gmra.mrb[0].mxu0 %v24_v25  ;;  %416 = vmatpush3.bf16.msra.mxu1 %v413_v60 }
  0x25   :  { %418 = vmatprep.subr.bf16.mxu1 %v417_v62 }
  0x28   :  { %420 = vmatpush3.bf16.msra.mxu1 %v417_v62 }
  0xf7   :  { %v321_v27 = vpop.f32.mrb[0].mxu0 }
  0xf8   :  { %v114_v28 = vpop.f32.mrb[1].mxu0  ;;  %v120_v30 = vadd.f32 %v321_v27, %v249_v26 }
  0xf9   :  { %v115_v29 = vadd.f32 %v249_v26, %v114_v28 }
  0xfb   :  { %123 = vmax.xlane.f32.xlu0 %v115_v29 }
  0xff   :  { %125 = vmax.xlane.f32.xlu0 %v120_v30 }
 0x188   :  { %v124_v43 = vpop.xlane.xlu0 %123 }
 0x189   :  { %v127_v44 = vsub.f32 %v115_v29, %v124_v43 }
 0x18b   :  { %v129_v45 = vmul.f32 1.442695, %v127_v44 }
 0x18c   :  { %v126_v46 = vpop.xlane.xlu0 %125 }
 0x18d   :  { %421 = vpow2.f32 %v129_v45  ;;  %v128_v47 = vsub.f32 %v120_v30, %v126_v46 }
 0x18f   :  { %v131_v48 = vmul.f32 1.442695, %v128_v47 }
 0x191   :  { %423 = vpow2.f32 %v131_v48 }
 0x197   :  { %v422_v49 = vpop.eup %421 }
 0x198   :  { %133 = vadd.xlane.f32.xlu1 %v422_v49 }
 0x19b   :  { %v424_v50 = vpop.eup %423 }
 0x19c   :  { %135 = vadd.xlane.f32.xlu1 %v424_v50 }
 0x225   :  { %v134_v63 = vpop.xlane.xlu1 %133 }
 0x226   :  { %425 = vrcp.f32 %v134_v63 }
 0x229   :  { %v136_v0 = vpop.xlane.xlu1 %135 }
 0x22a   :  { %427 = vrcp.f32 %v136_v0 }
 0x230   :  { %v426_v1 = vpop.eup %425 }
 0x231   :  { %v139_v2 = vmul.f32 %v426_v1, %v422_v49 }
 0x233   :  { %354 = vmatprep.mubr.f32.mxu1 %v139_v2 }
 0x234   :  { %v428_v3 = vpop.eup %427 }
 0x235   :  { %v140_v4 = vmul.f32 %v428_v3, %v424_v50 }
 0x237   :  { %355 = vmatmul.mubr.f32.vlgmr.msra.gmra.mrb[0].mxu1 %v140_v4 }
 0x30a   :  { %v356_v6 = vpop.f32.mrb[0].mxu1 }
 0x30b   :  { %v236_v8 = vadd.f32 %v356_v6, %v250_v5  ;;  %v230_v9 = vpop.f32.mrb[1].mxu1 }
 0x30c   :  { %v231_v11 = vadd.f32 %v250_v5, %v230_v9 }
 0x30d   :  { %v242_v12 = vadd.f32 %v240_v7, %v236_v8 }
 0x30e   :  { %v241_v13 = vadd.f32 %v239_v10, %v231_v11 }
 0x30f   :  { %244 = vst [vmem:[%s590_s6 + $0x8] sm:$0xff] %v242_v12 }
 0x310   :  { %243 = vst [vmem:[%s590_s6] sm:$0xff] %v241_v13 }

</bundles_post_ra>
